<compile_context>
chip_gen: v6e
topology: v6e:2x2x1
jax: 0.10.0
libtpu: 0.0.40
codegen_flags: <defaults>
</compile_context>

<pallas_src>
import jax
import jax.numpy as jnp
import numpy as np
from jax.experimental import pallas as pl
from jax.experimental.pallas import tpu as pltpu

EPS = 1e-5  # PyTorch BatchNorm2d default eps


# ----------------------------- Pallas kernel --------------------------------
def relation_kernel(x_ref, w1_ref, wconv_ref, bconv_ref, wfc_ref, bfc_ref,
                    wsh_ref, bsh_ref, out_ref):
    x = x_ref[...]                                              # (TB, 2C) f32

    # level 1: first convs of all three branches fused into one matmul
    h = jnp.dot(x, w1_ref[...], preferred_element_type=jnp.float32)
    h = jnp.maximum(h + bconv_ref[0:1, :], 0.0)                 # (TB, 3D)

    # levels 2..4: block-diagonal per-branch convs (identity blocks carry
    # already-finished branches through, bit-exactly, since h >= 0).
    for i in range(3):                                          # static unroll
        h = jnp.dot(h, wconv_ref[i], preferred_element_type=jnp.float32)
        h = jnp.maximum(h + bconv_ref[i + 1:i + 2, :], 0.0)

    # fc1 / fc2 / fc3 fused as one block-diagonal Linear + ReLU
    o = jnp.dot(h, wfc_ref[...], preferred_element_type=jnp.float32)
    o = jnp.maximum(o + bfc_ref[...], 0.0)                      # (TB, 3H)

    # fc_share (the torch.cat is implicit: o is already the concatenation)
    out_ref[...] = (jnp.dot(o, wsh_ref[...], preferred_element_type=jnp.float32)
                    + bsh_ref[...])                             # (TB, 1)


# ------------------------ one-time parameter packing ------------------------
def _block_diag(blocks):
    rows = sum(b.shape[0] for b in blocks)
    cols = sum(b.shape[1] for b in blocks)
    out = jnp.zeros((rows, cols), jnp.float32)
    r = c = 0
    for b in blocks:
        out = out.at[r:r + b.shape[0], c:c + b.shape[1]].set(b)
        r += b.shape[0]
        c += b.shape[1]
    return out


def prepare_packed_params(params):
    """Fold BN into the convs and pack everything into 8 arrays (done once)."""
    convs = params["convs"]
    fcs = params["fcs"]

    def fold(idx):
        w, b, gamma, beta, mean, var = convs[idx]
        s = gamma / jnp.sqrt(var + EPS)
        wt = (w.T * s[None, :]).astype(jnp.float32)     # (in, out), BN folded
        bt = (b * s + beta - mean * s).astype(jnp.float32)
        return wt, bt

    # conv list layout: [1_1, 1_2, 2_1, 2_2, 2_3, 3_1, 3_2, 3_3, 3_4]
    w11, b11 = fold(0); w12, b12 = fold(1)
    w21, b21 = fold(2); w22, b22 = fold(3); w23, b23 = fold(4)
    w31, b31 = fold(5); w32, b32 = fold(6); w33, b33 = fold(7); w34, b34 = fold(8)

    D = w11.shape[1]
    eye = jnp.eye(D, dtype=jnp.float32)
    zb = jnp.zeros((D,), jnp.float32)

    W_L1 = jnp.concatenate([w11, w21, w31], axis=1)             # (2C, 3D)
    W_conv = jnp.stack([_block_diag([w12, w22, w32]),
                        _block_diag([eye, w23, w33]),
                        _block_diag([eye, eye, w34])], axis=0)  # (3, 3D, 3D)
    B_conv = jnp.stack([jnp.concatenate([b11, b21, b31]),
                        jnp.concatenate([b12, b22, b32]),
                        jnp.concatenate([zb, b23, b33]),
                        jnp.concatenate([zb, zb, b34])], axis=0)  # (4, 3D)

    W_fc = _block_diag([fcs[0][0].T, fcs[1][0].T, fcs[2][0].T])   # (3D, 3H)
    b_fc = jnp.concatenate([fcs[0][1], fcs[1][1], fcs[2][1]])[None, :]  # (1,3H)

    w_share = fcs[3][0].T.astype(jnp.float32)                   # (3H, 1)
    b_share = fcs[3][1].reshape(1, 1).astype(jnp.float32)       # (1, 1)

    return dict(W_L1=W_L1, W_conv=W_conv, B_conv=B_conv,
                W_fc=W_fc, b_fc=b_fc, w_share=w_share, b_share=b_share)


# --------------------------------- wrapper -----------------------------------
def relationnet_forward(x_nchw, packed, *, batch_tile=128):
    B = x_nchw.shape[0]
    x = x_nchw.reshape(B, -1).astype(jnp.float32)   # H = W = 1  ->  (B, 2C)
    C2 = x.shape[1]

    # batch tile: multiple of 8 sublanes, capped at batch_tile
    TB = min(batch_tile, pl.cdiv(B, 8) * 8)
    TB = max(8, (TB // 8) * 8)
    Bp = pl.cdiv(B, TB) * TB
    if Bp != B:
        x = jnp.pad(x, ((0, Bp - B), (0, 0)))
    nb = Bp // TB

    W_L1, W_conv, B_conv = packed["W_L1"], packed["W_conv"], packed["B_conv"]
    W_fc, b_fc = packed["W_fc"], packed["b_fc"]
    w_share, b_share = packed["w_share"], packed["b_share"]
    D3 = W_L1.shape[1]
    H3 = W_fc.shape[1]

    flops = int(2 * Bp * (C2 * D3 + 3 * D3 * D3 + D3 * H3 + H3))
    bytes_accessed = int(4 * (x.size + W_L1.size + W_conv.size + B_conv.size +
                              W_fc.size + b_fc.size + w_share.size +
                              b_share.size + Bp))

    def resident(a):  # weight arrays: whole array resident in VMEM every step
        if a.ndim == 2:
            return pl.BlockSpec(a.shape, lambda i: (0, 0))
        return pl.BlockSpec(a.shape, lambda i: (0, 0, 0))

    out = pl.pallas_call(
        relation_kernel,
        out_shape=jax.ShapeDtypeStruct((Bp, 1), jnp.float32),
        grid=(nb,),
        in_specs=[pl.BlockSpec((TB, C2), lambda i: (i, 0)),
                  resident(W_L1), resident(W_conv), resident(B_conv),
                  resident(W_fc), resident(b_fc),
                  resident(w_share), resident(b_share)],
        out_specs=pl.BlockSpec((TB, 1), lambda i: (i, 0)),
        compiler_params=pltpu.CompilerParams(
            dimension_semantics=("parallel",)),
        cost_estimate=pl.CostEstimate(flops=flops, transcendentals=0,
                                      bytes_accessed=bytes_accessed),
    )(x, W_L1, W_conv, B_conv, W_fc, b_fc, w_share, b_share)
    return out[:B]


# --------------------------- pure-JAX reference ------------------------------
def reference_forward(x_nchw, params):
    x = x_nchw.reshape(x_nchw.shape[0], -1).astype(jnp.float32)
    convs = params["convs"]

    def conv_chain(h, layers):
        for (w, b, g, be, m, v) in layers:
            y = h @ w.T + b
            y = (y - m) / jnp.sqrt(v + EPS) * g + be
            h = jnp.maximum(y, 0.0)
        return h

    h1 = conv_chain(x, convs[0:2])
    h2 = conv_chain(x, convs[2:5])
    h3 = conv_chain(x, convs[5:9])
    fcs = params["fcs"]
    o1 = jnp.maximum(h1 @ fcs[0][0].T + fcs[0][1], 0.0)
    o2 = jnp.maximum(h2 @ fcs[1][0].T + fcs[1][1], 0.0)
    o3 = jnp.maximum(h3 @ fcs[2][0].T + fcs[2][1], 0.0)
    cat = jnp.concatenate([o1, o2, o3], axis=1)
    return cat @ fcs[3][0].T + fcs[3][1]


# --------------------------- deterministic init ------------------------------
def init_params(key, in_ch, middle_dim, hidden_size):
    conv_shapes = (
        [(middle_dim, in_ch), (middle_dim, middle_dim)] +                # branch 1
        [(middle_dim, in_ch)] + [(middle_dim, middle_dim)] * 2 +         # branch 2
        [(middle_dim, in_ch)] + [(middle_dim, middle_dim)] * 3           # branch 3
    )
    convs = []
    for shp in conv_shapes:
        key, kw, kb, kg, kbe, km, kv = jax.random.split(key, 7)
        out_c, in_c = shp
        convs.append((
            jax.random.normal(kw, (out_c, in_c), jnp.float32) * 0.1,     # conv W
            jax.random.normal(kb, (out_c,), jnp.float32) * 0.1,          # conv b
            1.0 + 0.1 * jax.random.normal(kg, (out_c,), jnp.float32),    # gamma
            0.1 * jax.random.normal(kbe, (out_c,), jnp.float32),         # beta
            0.1 * jax.random.normal(km, (out_c,), jnp.float32),          # mean
            1.0 + 0.1 * jnp.abs(jax.random.normal(kv, (out_c,), jnp.float32)),
        ))

    fc_shapes = [(hidden_size, middle_dim)] * 3 + [(1, hidden_size * 3)]
    fcs = []
    for shp in fc_shapes:
        key, kw, kb = jax.random.split(key, 3)
        out_f, in_f = shp
        fcs.append((
            jax.random.normal(kw, (out_f, in_f), jnp.float32) * 0.1,
            jax.random.normal(kb, (out_f,), jnp.float32) * 0.1,
        ))
    return {"convs": convs, "fcs": fcs}


# ----------------------------------- main ------------------------------------
if __name__ == "__main__":
    B = 8
    C_half = 16              # small stand-in for input_size[0] = 64
    in_ch = 2 * C_half       # module concatenates two features -> input_size[0]*2
    middle_dim = 32
    hidden_size = 8

    key = jax.random.PRNGKey(0)
    key, kx = jax.random.split(key)
    # PyTorch-layout input (B, 2*C, 1, 1); spatial must be 1x1 for fc1/2/3.
    x = jax.random.normal(kx, (B, in_ch, 1, 1), jnp.float32)

    params = init_params(key, in_ch, middle_dim, hidden_size)
    packed = prepare_packed_params(params)   # hoisted one-time prep

    out = relationnet_forward(x, packed)
    out = jax.block_until_ready(out)

    ref = reference_forward(x, params)
    np.testing.assert_allclose(np.asarray(out), np.asarray(ref),
                               rtol=1e-4, atol=1e-4)
    assert out.shape == (B, 1)
    print("KERNEL_OK")
</pallas_src>

<mosaic_0001>
module attributes {stable_mosaic.version = 11 : i64} {
  func.func @relation_kernel(%arg0: i32, %arg1: memref<8x32xf32, #tpu.memory_space<vmem>>, %arg2: memref<32x96xf32, #tpu.memory_space<vmem>>, %arg3: memref<3x96x96xf32, #tpu.memory_space<vmem>>, %arg4: memref<4x96xf32, #tpu.memory_space<vmem>>, %arg5: memref<96x24xf32, #tpu.memory_space<vmem>>, %arg6: memref<1x24xf32, #tpu.memory_space<vmem>>, %arg7: memref<24x1xf32, #tpu.memory_space<vmem>>, %arg8: memref<1x1xf32, #tpu.memory_space<vmem>>, %arg9: memref<8x1xf32, #tpu.memory_space<vmem>>) attributes {dimension_semantics = [#tpu.dimension_semantics<parallel>], iteration_bounds = array<i64: 1>, scalar_prefetch = 0 : i64, scratch_operands = 0 : i64, tpu.core_type = #tpu.core_type<tc>, window_params = [{transform_indices = @transform_0, window_bounds = array<i64: 8, 32>}, {pipeline_mode = #tpu.pipeline_mode<synchronous>, transform_indices = @transform_1, window_bounds = array<i64: 32, 96>}, {pipeline_mode = #tpu.pipeline_mode<synchronous>, transform_indices = @transform_2, window_bounds = array<i64: 3, 96, 96>}, {pipeline_mode = #tpu.pipeline_mode<synchronous>, transform_indices = @transform_3, window_bounds = array<i64: 4, 96>}, {pipeline_mode = #tpu.pipeline_mode<synchronous>, transform_indices = @transform_4, window_bounds = array<i64: 96, 24>}, {pipeline_mode = #tpu.pipeline_mode<synchronous>, transform_indices = @transform_5, window_bounds = array<i64: 1, 24>}, {pipeline_mode = #tpu.pipeline_mode<synchronous>, transform_indices = @transform_6, window_bounds = array<i64: 24, 1>}, {pipeline_mode = #tpu.pipeline_mode<synchronous>, transform_indices = @transform_7, window_bounds = array<i64: 1, 1>}, {transform_indices = @transform_8, window_bounds = array<i64: 8, 1>}]} {
    %c0 = arith.constant 0 : index
    %c0_0 = arith.constant 0 : index
    %0 = vector.load %arg1[%c0, %c0_0] : memref<8x32xf32, #tpu.memory_space<vmem>>, vector<8x32xf32>
    %c0_1 = arith.constant 0 : index
    %c0_2 = arith.constant 0 : index
    %1 = vector.load %arg2[%c0_1, %c0_2] : memref<32x96xf32, #tpu.memory_space<vmem>>, vector<32x96xf32>
    %cst = arith.constant dense<0.000000e+00> : vector<8x96xf32>
    %2 = tpu.matmul %0, %1, %cst {dimension_numbers = #tpu.dot_dimension_numbers<[1], [0], [0], [1], [0, 0, 1, 1], [], []>} : vector<8x32xf32>, vector<32x96xf32>, vector<8x96xf32> -> vector<8x96xf32>
    %c0_3 = arith.constant 0 : index
    %c0_4 = arith.constant 0 : index
    %3 = vector.load %arg4[%c0_3, %c0_4] : memref<4x96xf32, #tpu.memory_space<vmem>>, vector<1x96xf32>
    %4 = vector.broadcast %3 : vector<1x96xf32> to vector<8x96xf32>
    %5 = arith.addf %2, %4 : vector<8x96xf32>
    %cst_5 = arith.constant 0.000000e+00 : f32
    %6 = vector.broadcast %cst_5 : f32 to vector<8x96xf32>
    %7 = arith.maximumf %5, %6 : vector<8x96xf32>
    %c0_6 = arith.constant 0 : index
    %c0_7 = arith.constant 0 : index
    %c0_8 = arith.constant 0 : index
    %8 = vector.load %arg3[%c0_6, %c0_7, %c0_8] : memref<3x96x96xf32, #tpu.memory_space<vmem>>, vector<1x96x96xf32>
    %9 = vector.shape_cast %8 : vector<1x96x96xf32> to vector<96x96xf32>
    %cst_9 = arith.constant dense<0.000000e+00> : vector<8x96xf32>
    %10 = tpu.matmul %7, %9, %cst_9 {dimension_numbers = #tpu.dot_dimension_numbers<[1], [0], [0], [1], [0, 0, 1, 1], [], []>} : vector<8x96xf32>, vector<96x96xf32>, vector<8x96xf32> -> vector<8x96xf32>
    %c1 = arith.constant 1 : index
    %c0_10 = arith.constant 0 : index
    %11 = vector.load %arg4[%c1, %c0_10] : memref<4x96xf32, #tpu.memory_space<vmem>>, vector<1x96xf32>
    %12 = vector.broadcast %11 : vector<1x96xf32> to vector<8x96xf32>
    %13 = arith.addf %10, %12 : vector<8x96xf32>
    %cst_11 = arith.constant 0.000000e+00 : f32
    %14 = vector.broadcast %cst_11 : f32 to vector<8x96xf32>
    %15 = arith.maximumf %13, %14 : vector<8x96xf32>
    %c1_12 = arith.constant 1 : index
    %c0_13 = arith.constant 0 : index
    %c0_14 = arith.constant 0 : index
    %16 = vector.load %arg3[%c1_12, %c0_13, %c0_14] : memref<3x96x96xf32, #tpu.memory_space<vmem>>, vector<1x96x96xf32>
    %17 = vector.shape_cast %16 : vector<1x96x96xf32> to vector<96x96xf32>
    %cst_15 = arith.constant dense<0.000000e+00> : vector<8x96xf32>
    %18 = tpu.matmul %15, %17, %cst_15 {dimension_numbers = #tpu.dot_dimension_numbers<[1], [0], [0], [1], [0, 0, 1, 1], [], []>} : vector<8x96xf32>, vector<96x96xf32>, vector<8x96xf32> -> vector<8x96xf32>
    %c2 = arith.constant 2 : index
    %c0_16 = arith.constant 0 : index
    %19 = vector.load %arg4[%c2, %c0_16] : memref<4x96xf32, #tpu.memory_space<vmem>>, vector<1x96xf32>
    %20 = vector.broadcast %19 : vector<1x96xf32> to vector<8x96xf32>
    %21 = arith.addf %18, %20 : vector<8x96xf32>
    %cst_17 = arith.constant 0.000000e+00 : f32
    %22 = vector.broadcast %cst_17 : f32 to vector<8x96xf32>
    %23 = arith.maximumf %21, %22 : vector<8x96xf32>
    %c2_18 = arith.constant 2 : index
    %c0_19 = arith.constant 0 : index
    %c0_20 = arith.constant 0 : index
    %24 = vector.load %arg3[%c2_18, %c0_19, %c0_20] : memref<3x96x96xf32, #tpu.memory_space<vmem>>, vector<1x96x96xf32>
    %25 = vector.shape_cast %24 : vector<1x96x96xf32> to vector<96x96xf32>
    %cst_21 = arith.constant dense<0.000000e+00> : vector<8x96xf32>
    %26 = tpu.matmul %23, %25, %cst_21 {dimension_numbers = #tpu.dot_dimension_numbers<[1], [0], [0], [1], [0, 0, 1, 1], [], []>} : vector<8x96xf32>, vector<96x96xf32>, vector<8x96xf32> -> vector<8x96xf32>
    %c3 = arith.constant 3 : index
    %c0_22 = arith.constant 0 : index
    %27 = vector.load %arg4[%c3, %c0_22] : memref<4x96xf32, #tpu.memory_space<vmem>>, vector<1x96xf32>
    %28 = vector.broadcast %27 : vector<1x96xf32> to vector<8x96xf32>
    %29 = arith.addf %26, %28 : vector<8x96xf32>
    %cst_23 = arith.constant 0.000000e+00 : f32
    %30 = vector.broadcast %cst_23 : f32 to vector<8x96xf32>
    %31 = arith.maximumf %29, %30 : vector<8x96xf32>
    %c0_24 = arith.constant 0 : index
    %c0_25 = arith.constant 0 : index
    %32 = vector.load %arg5[%c0_24, %c0_25] : memref<96x24xf32, #tpu.memory_space<vmem>>, vector<96x24xf32>
    %cst_26 = arith.constant dense<0.000000e+00> : vector<8x24xf32>
    %33 = tpu.matmul %31, %32, %cst_26 {dimension_numbers = #tpu.dot_dimension_numbers<[1], [0], [0], [1], [0, 0, 1, 1], [], []>} : vector<8x96xf32>, vector<96x24xf32>, vector<8x24xf32> -> vector<8x24xf32>
    %c0_27 = arith.constant 0 : index
    %c0_28 = arith.constant 0 : index
    %34 = vector.load %arg6[%c0_27, %c0_28] : memref<1x24xf32, #tpu.memory_space<vmem>>, vector<1x24xf32>
    %35 = vector.broadcast %34 : vector<1x24xf32> to vector<8x24xf32>
    %36 = arith.addf %33, %35 : vector<8x24xf32>
    %cst_29 = arith.constant 0.000000e+00 : f32
    %37 = vector.broadcast %cst_29 : f32 to vector<8x24xf32>
    %38 = arith.maximumf %36, %37 : vector<8x24xf32>
    %c0_30 = arith.constant 0 : index
    %c0_31 = arith.constant 0 : index
    %39 = vector.load %arg7[%c0_30, %c0_31] : memref<24x1xf32, #tpu.memory_space<vmem>>, vector<24x1xf32>
    %cst_32 = arith.constant dense<0.000000e+00> : vector<8x1xf32>
    %40 = tpu.matmul %38, %39, %cst_32 {dimension_numbers = #tpu.dot_dimension_numbers<[1], [0], [0], [1], [0, 0, 1, 1], [], []>} : vector<8x24xf32>, vector<24x1xf32>, vector<8x1xf32> -> vector<8x1xf32>
    %c0_33 = arith.constant 0 : index
    %c0_34 = arith.constant 0 : index
    %41 = vector.load %arg8[%c0_33, %c0_34] : memref<1x1xf32, #tpu.memory_space<vmem>>, vector<1x1xf32>
    %42 = vector.broadcast %41 : vector<1x1xf32> to vector<8x1xf32>
    %43 = arith.addf %40, %42 : vector<8x1xf32>
    %c0_35 = arith.constant 0 : index
    %c0_36 = arith.constant 0 : index
    %44 = vector.load %arg9[%c0_35, %c0_36] : memref<8x1xf32, #tpu.memory_space<vmem>>, vector<8x1xf32>
    tpu.vector_store %arg9[%c0_35, %c0_36], %43 {strides = array<i32>} : memref<8x1xf32, #tpu.memory_space<vmem>>, vector<8x1xf32>,
    return
  }
  func.func @transform_0(%arg0: i32) -> (i32, i32) {
    %c0_i32 = arith.constant 0 : i32
    %c0_i32_0 = arith.constant 0 : i32
    return %arg0, %c0_i32 : i32, i32
  }
  func.func @transform_1(%arg0: i32) -> (i32, i32) {
    %c0_i32 = arith.constant 0 : i32
    %c0_i32_0 = arith.constant 0 : i32
    %c0_i32_1 = arith.constant 0 : i32
    return %c0_i32, %c0_i32_0 : i32, i32
  }
  func.func @transform_2(%arg0: i32) -> (i32, i32, i32) {
    %c0_i32 = arith.constant 0 : i32
    %c0_i32_0 = arith.constant 0 : i32
    %c0_i32_1 = arith.constant 0 : i32
    %c0_i32_2 = arith.constant 0 : i32
    return %c0_i32, %c0_i32_0, %c0_i32_1 : i32, i32, i32
  }
  func.func @transform_3(%arg0: i32) -> (i32, i32) {
    %c0_i32 = arith.constant 0 : i32
    %c0_i32_0 = arith.constant 0 : i32
    %c0_i32_1 = arith.constant 0 : i32
    return %c0_i32, %c0_i32_0 : i32, i32
  }
  func.func @transform_4(%arg0: i32) -> (i32, i32) {
    %c0_i32 = arith.constant 0 : i32
    %c0_i32_0 = arith.constant 0 : i32
    %c0_i32_1 = arith.constant 0 : i32
    return %c0_i32, %c0_i32_0 : i32, i32
  }
  func.func @transform_5(%arg0: i32) -> (i32, i32) {
    %c0_i32 = arith.constant 0 : i32
    %c0_i32_0 = arith.constant 0 : i32
    %c0_i32_1 = arith.constant 0 : i32
    return %c0_i32, %c0_i32_0 : i32, i32
  }
  func.func @transform_6(%arg0: i32) -> (i32, i32) {
    %c0_i32 = arith.constant 0 : i32
    %c0_i32_0 = arith.constant 0 : i32
    %c0_i32_1 = arith.constant 0 : i32
    return %c0_i32, %c0_i32_0 : i32, i32
  }
  func.func @transform_7(%arg0: i32) -> (i32, i32) {
    %c0_i32 = arith.constant 0 : i32
    %c0_i32_0 = arith.constant 0 : i32
    %c0_i32_1 = arith.constant 0 : i32
    return %c0_i32, %c0_i32_0 : i32, i32
  }
  func.func @transform_8(%arg0: i32) -> (i32, i32) {
    %c0_i32 = arith.constant 0 : i32
    %c0_i32_0 = arith.constant 0 : i32
    return %arg0, %c0_i32 : i32, i32
  }
}

</mosaic_0001>

<bundles_post_ra>
// kernel: tpu_custom_call.1
= control target key start
LH: loop header
LB: loop body
LE: loop exit
PB: predicated region body
PF: predicated region fallthrough
CT: control target
= control target key end

     0   :  { %s1023_s0 = inlined_call_operand.vmem [shape: f32[8,32], index: 0, kind: input, shape index: {}]   ;;  %s1024_s1 = inlined_call_operand.vmem [shape: f32[32,96], index: 1, kind: input, shape index: {}]   ;;  %s1025_s2 = inlined_call_operand.hbm [shape: f32[3,96,96], index: 2, kind: input, shape index: {}]   ;;  %s1026_s3 = inlined_call_operand.vmem [shape: f32[4,96], index: 3, kind: input, shape index: {}]   ;;  %s1027_s4 = inlined_call_operand.vmem [shape: f32[96,24], index: 4, kind: input, shape index: {}]   ;;  %s1028_s5 = inlined_call_operand.vmem [shape: f32[1,24], index: 5, kind: input, shape index: {}]   ;;  %s1029_s6 = inlined_call_operand.vmem [shape: f32[24,1], index: 6, kind: input, shape index: {}]   ;;  %s1030_s7 = inlined_call_operand.<no memory space> [shape: f32[1,1], index: 7, kind: input, shape index: {}]   ;;  %s1031_s8 = inlined_call_operand.vmem [shape: f32[8,1], index: 8, kind: output, shape index: {}]  }
   0x1   :  { %v13_v0 = vstv %s1030_s7 }
   0x2   :  { %14 = vst [vmem:[#allocation2] sm:$0x1] %v13_v0 }
   0x3   :  { %15 = vsyncpa [#allocation4], 0  ;;  %s818_s29 = smov [#allocation3]  }
   0x4   :  { %s25_s30 = sshll.u32 %s818_s29, 4  ;;  %s26_s30 = int_to_ptr.vmem [resolvable:$true] %s25_s30 }
   0x5   :  { %s804_s9 = scalar_lea.vmem %s26_s30, 4608  ;;  %p809_p1 = scmp.lt.s32.totalorder %s26_s30, %s26_s30 }
   0x6   :  { %p805_p0 = scmp.ne.s32.totalorder %s26_s30, %s804_s9  ;;  %p810_p2 = scmp.lt.s32.totalorder %s804_s9, %s804_s9 }
   0x8   :  { %p811_p3 = por %p810_p2, %p809_p1 }
   0xa   :  { %p812_p4 = pnand %p811_p3, %p805_p0 }
   0xc   :  { %815 = shalt.err (!%p812_p4)
}
   0xd   :  { %s819_s10 = smov 128   ;;  %s820_s11 = smov 8  }
   0xe   :  { %31 = dma.hbm_to_vmem [thread:$0]  %s1025_s2, 4608, %s26_s30, [#allocation4], %s819_s10, %s819_s10, %s820_s11  }
   0xf   :  { %816 = dma.done.wait [#allocation4], 4608  }
  0x10   :  { %817 = vsyncadd [#allocation4], 4294962688  ;;  %v821_v1 = vmov 0.0   ;;  %vm822_vm0 = vmmov 0   ;;  %v49_v2 = vld [vmem:[%s1024_s1 + $0x18] sm:$0xff]  ;;  %v48_v3 = vld [vmem:[%s1024_s1 + $0x10] sm:$0xff] }
  0x11   :  { %663 = vmatprep.subr.mxu0 %v821_v1  ;;  %671 = vmatprep.mubr.msk.f32.mxu0 %vm822_vm0, %v821_v1  ;;  %v141_v4 = vld [vmem:[#allocation3 + $0x58] sm:$0xff]  ;;  %v47_v5 = vld [vmem:[%s1024_s1 + $0x8] sm:$0xff]  ;;  %v140_v6 = vld [vmem:[#allocation3 + $0x50] sm:$0xff]  ;;  %vm55_vm1 = vcmask 261120   ;;  %vm147_vm2 = vcmask 785408   ;;  %vm509_vm3 = vcmask 195584  }
  0x12   :  { %674 = vmatprep.subr.mxu1 %v821_v1  ;;  %698 = vmatprep.mubr.msk.f32.mxu1 %vm822_vm0, %v821_v1  ;;  %v139_v7 = vld [vmem:[#allocation3 + $0x48] sm:$0xff]  ;;  %v46_v8 = vld [vmem:[%s1024_s1] sm:$0xff]  ;;  %v136_v12 = vld [vmem:[#allocation3 + $0x30] sm:$0xff]  ;;  %vm583_vm4 = vcmask 7168  }
  0x13   :  { %664 = vmatpush3.msra.mxu0 %v49_v2  ;;  %675 = vmatpush3.msra.mxu1 %v141_v4  ;;  %v45_v9 = vld [vmem:[%s1023_s0] sm:$0xff]  ;;  %v135_v13 = vld [vmem:[#allocation3 + $0x28] sm:$0xff]  ;;  %v132_v16 = vld [vmem:[#allocation3 + $0x10] sm:$0xff] }
  0x14   :  { %665 = vmatprep.subr.mxu0 %v821_v1  ;;  %676 = vmatprep.subr.mxu1 %v821_v1  ;;  %v138_v10 = vld [vmem:[#allocation3 + $0x40] sm:$0xff]  ;;  %v137_v11 = vld [vmem:[#allocation3 + $0x38] sm:$0xff]  ;;  %v131_v17 = vld [vmem:[#allocation3 + $0x8] sm:$0xff] }
  0x15   :  { %666 = vmatpush3.msra.mxu0 %v48_v3  ;;  %677 = vmatpush3.msra.mxu1 %v140_v6  ;;  %v134_v14 = vld [vmem:[#allocation3 + $0x20] sm:$0xff]  ;;  %v133_v15 = vld [vmem:[#allocation3 + $0x18] sm:$0xff]  ;;  %v233_v20 = vld [vmem:[#allocation3 + $0xb0] sm:$0xff] }
  0x16   :  { %667 = vmatprep.subr.mxu0 %v821_v1  ;;  %678 = vmatprep.subr.mxu1 %v821_v1  ;;  %v130_v18 = vld [vmem:[#allocation3] sm:$0xff]  ;;  %v234_v19 = vld [vmem:[#allocation3 + $0xb8] sm:$0xff]  ;;  %v232_v21 = vld [vmem:[#allocation3 + $0xa8] sm:$0xff] }
  0x17   :  { %668 = vmatpush3.msra.mxu0 %v47_v5  ;;  %679 = vmatpush3.msra.mxu1 %v139_v7  ;;  %v231_v22 = vld [vmem:[#allocation3 + $0xa0] sm:$0xff]  ;;  %v230_v23 = vld [vmem:[#allocation3 + $0x98] sm:$0xff]  ;;  %v229_v24 = vld [vmem:[#allocation3 + $0x90] sm:$0xff] }
  0x18   :  { %669 = vmatprep.subr.mxu0 %v821_v1  ;;  %680 = vmatprep.subr.mxu1 %v821_v1  ;;  %v228_v25 = vld [vmem:[#allocation3 + $0x88] sm:$0xff]  ;;  %v227_v26 = vld [vmem:[#allocation3 + $0x80] sm:$0xff]  ;;  %v226_v27 = vld [vmem:[#allocation3 + $0x78] sm:$0xff] }
  0x19   :  { %670 = vmatpush3.msra.mxu0 %v46_v8  ;;  %681 = vmatpush3.msra.mxu1 %v138_v10  ;;  %v590_v28 = vld [vmem:[%s1026_s3] ss:$0 sm:$0xff]  ;;  %v225_v33 = vld [vmem:[#allocation3 + $0x70] sm:$0xff]  ;;  %v224_v34 = vld [vmem:[#allocation3 + $0x68] sm:$0xff] }
  0x1a   :  { %672 = vmatmul.mubr.msk.f32.vlgmr.msra.gmra.mxu0 %vm55_vm1, %v45_v9  ;;  %682 = vmatprep.subr.mxu1 %v821_v1  ;;  %v223_v35 = vld [vmem:[#allocation3 + $0x60] sm:$0xff]  ;;  %v326_v36 = vld [vmem:[#allocation3 + $0x118] sm:$0xff]  ;;  %v325_v37 = vld [vmem:[#allocation3 + $0x110] sm:$0xff] }
  0x1b   :  { %701 = vmatprep.subr.mxu0 %v821_v1  ;;  %683 = vmatpush3.msra.mxu1 %v137_v11  ;;  %v324_v38 = vld [vmem:[#allocation3 + $0x108] sm:$0xff]  ;;  %v323_v39 = vld [vmem:[#allocation3 + $0x100] sm:$0xff]  ;;  %v322_v40 = vld [vmem:[#allocation3 + $0xf8] sm:$0xff] }
  0x1c   :  { %725 = vmatprep.mubr.msk.f32.mxu0 %vm822_vm0, %v821_v1  ;;  %684 = vmatprep.subr.mxu1 %v821_v1  ;;  %v321_v41 = vld [vmem:[#allocation3 + $0xf0] sm:$0xff]  ;;  %v320_v42 = vld [vmem:[#allocation3 + $0xe8] sm:$0xff]  ;;  %v319_v43 = vld [vmem:[#allocation3 + $0xe0] sm:$0xff] }
  0x1d   :  { %685 = vmatpush3.msra.mxu1 %v136_v12  ;;  %702 = vmatpush3.msra.mxu0 %v234_v19  ;;  %v318_v44 = vld [vmem:[#allocation3 + $0xd8] sm:$0xff]  ;;  %v592_v45 = vld [vmem:[%s1026_s3 + $0x1] ss:$0 sm:$0xff]  ;;  %v317_v50 = vld [vmem:[#allocation3 + $0xd0] sm:$0xff] }
  0x1e   :  { %686 = vmatprep.subr.mxu1 %v821_v1  ;;  %703 = vmatprep.subr.mxu0 %v821_v1  ;;  %v316_v51 = vld [vmem:[#allocation3 + $0xc8] sm:$0xff]  ;;  %v315_v52 = vld [vmem:[#allocation3 + $0xc0] sm:$0xff]  ;;  %v417_v53 = vld [vmem:[%s1027_s4 + $0x58] sm:$0xff] }
  0x1f   :  { %687 = vmatpush3.msra.mxu1 %v135_v13  ;;  %704 = vmatpush3.msra.mxu0 %v233_v20  ;;  %v416_v54 = vld [vmem:[%s1027_s4 + $0x50] sm:$0xff]  ;;  %v415_v55 = vld [vmem:[%s1027_s4 + $0x48] sm:$0xff]  ;;  %v414_v56 = vld [vmem:[%s1027_s4 + $0x40] sm:$0xff] }
  0x20   :  { %688 = vmatprep.subr.mxu1 %v821_v1  ;;  %705 = vmatprep.subr.mxu0 %v821_v1  ;;  %v413_v57 = vld [vmem:[%s1027_s4 + $0x38] sm:$0xff]  ;;  %v412_v58 = vld [vmem:[%s1027_s4 + $0x30] sm:$0xff]  ;;  %v411_v59 = vld [vmem:[%s1027_s4 + $0x28] sm:$0xff] }
  0x21   :  { %689 = vmatpush3.msra.mxu1 %v134_v14  ;;  %706 = vmatpush3.msra.mxu0 %v232_v21  ;;  %v410_v60 = vld [vmem:[%s1027_s4 + $0x20] sm:$0xff]  ;;  %v409_v61 = vld [vmem:[%s1027_s4 + $0x18] sm:$0xff]  ;;  %v408_v4 = vld [vmem:[%s1027_s4 + $0x10] sm:$0xff] }
  0x22   :  { %690 = vmatprep.subr.mxu1 %v821_v1  ;;  %707 = vmatprep.subr.mxu0 %v821_v1  ;;  %v594_v62 = vld [vmem:[%s1026_s3 + $0x2] ss:$0 sm:$0xff]  ;;  %v407_v5 = vld [vmem:[%s1027_s4 + $0x8] sm:$0xff]  ;;  %v596_v7 = vld [vmem:[%s1026_s3 + $0x3] ss:$0 sm:$0xff] }
  0x23   :  { %691 = vmatpush3.msra.mxu1 %v133_v15  ;;  %708 = vmatpush3.msra.mxu0 %v231_v22  ;;  %v406_v6 = vld [vmem:[%s1027_s4] sm:$0xff]  ;;  %v501_v12 = vld [vmem:[%s1029_s6 + $0x10] sm:$0xff]  ;;  %v500_v13 = vld [vmem:[%s1029_s6 + $0x8] sm:$0xff] }
  0x24   :  { %692 = vmatprep.subr.mxu1 %v821_v1  ;;  %709 = vmatprep.subr.mxu0 %v821_v1  ;;  %v499_v14 = vld [vmem:[%s1029_s6] sm:$0xff] }
  0x25   :  { %693 = vmatpush3.msra.mxu1 %v132_v16  ;;  %710 = vmatpush3.msra.mxu0 %v230_v23  ;;  %v598_v15 = vld [vmem:[%s1028_s5] ss:$0 sm:$0xff] }
  0x26   :  { %694 = vmatprep.subr.mxu1 %v821_v1  ;;  %711 = vmatprep.subr.mxu0 %v821_v1  ;;  %v600_v20 = vld [vmem:[#allocation2] ss:$0 sm:$0xff] }
  0x27   :  { %695 = vmatpush3.msra.mxu1 %v131_v17  ;;  %712 = vmatpush3.msra.mxu0 %v229_v24 }
  0x28   :  { %696 = vmatprep.subr.mxu1 %v821_v1  ;;  %713 = vmatprep.subr.mxu0 %v821_v1 }
  0x29   :  { %697 = vmatpush3.msra.mxu1 %v130_v18  ;;  %714 = vmatpush3.msra.mxu0 %v228_v25 }
  0x2a   :  { %728 = vmatprep.subr.mxu1 %v821_v1  ;;  %715 = vmatprep.subr.mxu0 %v821_v1 }
  0x2b   :  { %716 = vmatpush3.msra.mxu0 %v227_v26 }
  0x2c   :  { %717 = vmatprep.subr.mxu0 %v821_v1 }
  0x2d   :  { %718 = vmatpush3.msra.mxu0 %v226_v27 }
  0x2e   :  { %719 = vmatprep.subr.mxu0 %v821_v1 }
  0x2f   :  { %720 = vmatpush3.msra.mxu0 %v225_v33 }
  0x30   :  { %721 = vmatprep.subr.mxu0 %v821_v1 }
  0x31   :  { %722 = vmatpush3.msra.mxu0 %v224_v34 }
  0x32   :  { %723 = vmatprep.subr.mxu0 %v821_v1 }
  0x33   :  { %724 = vmatpush3.msra.mxu0 %v223_v35 }
  0x34   :  { %755 = vmatprep.subr.mxu0 %v821_v1 }
  0xda   :  { %v125_v29 = vpop.f32.mrf.mxu0 }
  0xdb   :  { %v126_v30 = vadd.f32 %v590_v28, %v125_v29 }
  0xdc   :  { %v673_v31 = vpop.f32.mrf.mxu0 }
  0xdd   :  { %v129_v32 = vmax.f32 %v126_v30, 0.0 }
  0xdf   :  { %699 = vmatmul.mubr.msk.f32.vlgmr.msra.gmra.mxu1 %vm147_vm2, %v129_v32 }
  0xe0   :  { %752 = vmatprep.mubr.msk.f32.mxu1 %vm822_vm0, %v821_v1  ;;  %729 = vmatpush3.msra.mxu1 %v326_v36 }
  0xe1   :  { %730 = vmatprep.subr.mxu1 %v821_v1 }
  0xe2   :  { %731 = vmatpush3.msra.mxu1 %v325_v37 }
  0xe3   :  { %732 = vmatprep.subr.mxu1 %v821_v1 }
  0xe4   :  { %733 = vmatpush3.msra.mxu1 %v324_v38 }
  0xe5   :  { %734 = vmatprep.subr.mxu1 %v821_v1 }
  0xe6   :  { %735 = vmatpush3.msra.mxu1 %v323_v39 }
  0xe7   :  { %736 = vmatprep.subr.mxu1 %v821_v1 }
  0xe8   :  { %737 = vmatpush3.msra.mxu1 %v322_v40 }
  0xe9   :  { %738 = vmatprep.subr.mxu1 %v821_v1 }
  0xea   :  { %739 = vmatpush3.msra.mxu1 %v321_v41 }
  0xeb   :  { %740 = vmatprep.subr.mxu1 %v821_v1 }
  0xec   :  { %741 = vmatpush3.msra.mxu1 %v320_v42 }
  0xed   :  { %742 = vmatprep.subr.mxu1 %v821_v1 }
  0xee   :  { %743 = vmatpush3.msra.mxu1 %v319_v43 }
  0xef   :  { %744 = vmatprep.subr.mxu1 %v821_v1 }
  0xf0   :  { %745 = vmatpush3.msra.mxu1 %v318_v44 }
  0xf1   :  { %746 = vmatprep.subr.mxu1 %v821_v1 }
  0xf2   :  { %747 = vmatpush3.msra.mxu1 %v317_v50 }
  0xf3   :  { %748 = vmatprep.subr.mxu1 %v821_v1 }
  0xf4   :  { %749 = vmatpush3.msra.mxu1 %v316_v51 }
  0xf5   :  { %750 = vmatprep.subr.mxu1 %v821_v1 }
  0xf6   :  { %751 = vmatpush3.msra.mxu1 %v315_v52 }
  0xf7   :  { %782 = vmatprep.subr.mxu1 %v821_v1 }
 0x19f   :  { %v217_v46 = vpop.f32.mrf.mxu1 }
 0x1a0   :  { %v218_v47 = vadd.f32 %v592_v45, %v217_v46 }
 0x1a1   :  { %v700_v48 = vpop.f32.mrf.mxu1 }
 0x1a2   :  { %v221_v49 = vmax.f32 %v218_v47, 0.0 }
 0x1a4   :  { %726 = vmatmul.mubr.msk.f32.vlgmr.msra.gmra.mxu0 %vm147_vm2, %v221_v49 }
 0x1a5   :  { %779 = vmatprep.mubr.msk.f32.mxu0 %vm822_vm0, %v821_v1  ;;  %756 = vmatpush3.msra.mxu0 %v417_v53 }
 0x1a6   :  { %757 = vmatprep.subr.mxu0 %v821_v1 }
 0x1a7   :  { %758 = vmatpush3.msra.mxu0 %v416_v54 }
 0x1a8   :  { %759 = vmatprep.subr.mxu0 %v821_v1 }
 0x1a9   :  { %760 = vmatpush3.msra.mxu0 %v415_v55 }
 0x1aa   :  { %761 = vmatprep.subr.mxu0 %v821_v1 }
 0x1ab   :  { %762 = vmatpush3.msra.mxu0 %v414_v56 }
 0x1ac   :  { %763 = vmatprep.subr.mxu0 %v821_v1 }
 0x1ad   :  { %764 = vmatpush3.msra.mxu0 %v413_v57 }
 0x1ae   :  { %765 = vmatprep.subr.mxu0 %v821_v1 }
 0x1af   :  { %766 = vmatpush3.msra.mxu0 %v412_v58 }
 0x1b0   :  { %767 = vmatprep.subr.mxu0 %v821_v1 }
 0x1b1   :  { %768 = vmatpush3.msra.mxu0 %v411_v59 }
 0x1b2   :  { %769 = vmatprep.subr.mxu0 %v821_v1 }
 0x1b3   :  { %770 = vmatpush3.msra.mxu0 %v410_v60 }
 0x1b4   :  { %771 = vmatprep.subr.mxu0 %v821_v1 }
 0x1b5   :  { %772 = vmatpush3.msra.mxu0 %v409_v61 }
 0x1b6   :  { %773 = vmatprep.subr.mxu0 %v821_v1 }
 0x1b7   :  { %774 = vmatpush3.msra.mxu0 %v408_v4 }
 0x1b8   :  { %775 = vmatprep.subr.mxu0 %v821_v1 }
 0x1b9   :  { %776 = vmatpush3.msra.mxu0 %v407_v5 }
 0x1ba   :  { %777 = vmatprep.subr.mxu0 %v821_v1 }
 0x1bb   :  { %778 = vmatpush3.msra.mxu0 %v406_v6 }
 0x264   :  { %v309_v63 = vpop.f32.mrf.mxu0 }
 0x265   :  { %v310_v0 = vadd.f32 %v594_v62, %v309_v63 }
 0x266   :  { %v727_v2 = vpop.f32.mrf.mxu0 }
 0x267   :  { %v313_v3 = vmax.f32 %v310_v0, 0.0 }
 0x269   :  { %753 = vmatmul.mubr.msk.f32.vlgmr.msra.gmra.mxu1 %vm147_vm2, %v313_v3 }
 0x26a   :  { %788 = vmatprep.mubr.msk.f32.mxu1 %vm822_vm0, %v821_v1  ;;  %783 = vmatpush3.msra.mxu1 %v501_v12 }
 0x26b   :  { %784 = vmatprep.subr.mxu1 %v821_v1 }
 0x26c   :  { %785 = vmatpush3.msra.mxu1 %v500_v13 }
 0x26d   :  { %786 = vmatprep.subr.mxu1 %v821_v1 }
 0x26e   :  { %787 = vmatpush3.msra.mxu1 %v499_v14 }
 0x329   :  { %v401_v8 = vpop.f32.mrf.mxu1 }
 0x32a   :  { %v402_v9 = vadd.f32 %v596_v7, %v401_v8 }
 0x32b   :  { %v754_v10 = vpop.f32.mrf.mxu1 }
 0x32c   :  { %v405_v11 = vmax.f32 %v402_v9, 0.0 }
 0x32e   :  { %780 = vmatmul.mubr.msk.f32.vlgmr.msra.gmra.mxu0 %vm147_vm2, %v405_v11 }
 0x3ee   :  { %v494_v16 = vpop.f32.mrf.mxu0 }
 0x3ef   :  { %v495_v17 = vadd.f32 %v598_v15, %v494_v16 }
 0x3f0   :  { %v781_v18 = vpop.f32.mrf.mxu0 }
 0x3f1   :  { %v498_v19 = vmax.f32 %v495_v17, 0.0 }
 0x3f3   :  { %789 = vmatmul.mubr.msk.f32.vlgmr.msra.gmra.mxu1 %vm509_vm3, %v498_v19 }
 0x4b3   :  { %v579_v21 = vpop.f32.mrf.mxu1 }
 0x4b4   :  { %v580_v22 = vadd.f32 %v600_v20, %v579_v21 }
 0x4b5   :  { %v790_v1 = vpop.f32.mrf.mxu1 }
 0x4b6   :  { %584 = vst.msk [vmem:[%s1031_s8] sm:$0xff] %vm583_vm4, %v580_v22 }
 0x4b7   :  { %589 = vsyncpa [#allocation4], 1 }

</bundles_post_ra>
